<compile_context>
chip_gen: v5e
topology: v5e:2x2
jax: 0.10.0
libtpu: 0.0.40
codegen_flags: <defaults>
</compile_context>

<pallas_src>
from functools import partial

import jax
import jax.numpy as jnp
from jax.experimental import pallas as pl
from jax.experimental.pallas import tpu as pltpu


def _round_up(a, b):
    return (a + b - 1) // b * b


def _pick_batch_block(n, cap=8):
    """Largest NB <= cap that divides n while keeping >= 2 grid steps
    (two parallel steps keep both v7x TensorCores busy; v5e/v6e don't care)."""
    if n <= 1:
        return 1
    best = 1
    for nb in range(1, min(cap, n) + 1):
        if n % nb == 0 and n // nb >= 2:
            best = nb
    return best


def _make_gated_conv_kernel(width, c_pad, hw, nb):
    """Kernel body. `width` (W) places the 3x3 taps in the flattened layout."""

    def kernel(xn_ref, wf_ref, bf_ref, mask_ref, out_ref, col_ref):
        # xn_ref  : (NB, C_pad, Lp_pad)  mxu_dtype, h-padded + flattened cat([x,noise])
        # wf_ref  : (2*Cout, 9*C_pad)    mxu_dtype, fused conv||gate weight, (kh,kw,c) cols
        # bf_ref  : (2*Cout, 1)          f32, fused conv||gate bias
        # mask_ref: (2, HW)              mxu_dtype, 0/1 lane masks emulating width pad
        # out_ref : (NB, Cout, HW)       f32
        # col_ref : (9*C_pad, NB*HW)     mxu_dtype VMEM scratch (im2col slab)
        cout = out_ref.shape[1]

        mask_left = mask_ref[0:1, :]     # valid lanes for the kw=0 taps
        mask_right = mask_ref[1:2, :]    # valid lanes for the kw=2 taps

        # Build the im2col slab.  For output pixel j = h*W + w, tap (kh, kw)
        # needs input pixel (h + kh - 1, w + kw - 1); in the height-padded flat
        # layout that is lane j + kh*W + kw + (W - 1).  Row group tap*C_pad of
        # the slab holds that shifted window; width masking fuses into the copy.
        for b in range(nb):
            for kh in range(3):
                for kw in range(3):
                    tap = kh * 3 + kw
                    start = kh * width + kw + (width - 1)
                    win = xn_ref[b, :, start:start + hw]          # (C_pad, HW)
                    if kw == 0:                                   # left pad col
                        win = win * mask_left
                    elif kw == 2:                                 # right pad col
                        win = win * mask_right
                    col_ref[tap * c_pad:(tap + 1) * c_pad,
                            b * hw:(b + 1) * hw] = win

        # Single MXU pass: (2*Cout, 9*C_pad) x (9*C_pad, NB*HW), f32 accumulate.
        acc = jnp.dot(wf_ref[...], col_ref[...],
                      preferred_element_type=jnp.float32)
        acc = acc + bf_ref[...]                   # bias, broadcast over lanes
        gated = acc[:cout, :] * jax.nn.sigmoid(acc[cout:, :])   # (Cout, NB*HW)

        for b in range(nb):
            out_ref[b] = gated[:, b * hw:(b + 1) * hw].astype(out_ref.dtype)

    return kernel


@partial(jax.jit, static_argnames=("mxu_dtype", "batch_block_cap"))
def gated_convolution(x, refined_noise, w_conv, b_conv, w_gate, b_gate,
                      mxu_dtype=jnp.bfloat16, batch_block_cap=8):
    """Forward pass of Gated_Convolution.

    x             : (N, Cin, H, W)        float32  (NCHW, as in PyTorch)
    refined_noise : (N, Cn,  H, W)        float32
    w_conv        : (Cout, Cin, 3, 3)     OIHW
    b_conv        : (Cout,)
    w_gate        : (Cout, Cin+Cn, 3, 3)  OIHW
    b_gate        : (Cout,)
    returns       : (N, Cout, H, W)       float32
    """
    N, Cin, H, W = x.shape
    Cn = refined_noise.shape[1]
    Cout = w_conv.shape[0]
    C = Cin + Cn
    HW = H * W

    itemsize = jnp.dtype(mxu_dtype).itemsize
    sub = 8 * max(1, 4 // itemsize)       # sublane-pack granularity: 8 f32, 16 bf16
    C_pad = _round_up(C, sub)
    Lp = (H + 4) * W                      # 2 zero rows above + below, flattened
    Lp_pad = _round_up(Lp, 128)
    K = 9 * C_pad

    NB = _pick_batch_block(N, batch_block_cap)
    grid = (N // NB,)

    # Activations: channel concat (== torch.cat) in mxu_dtype, zero-pad channels
    # to C_pad, pad height by 2 rows, flatten, then pad Lp to a lane multiple.
    # Zeros are APPENDED only, so every tap's `start` offset is unchanged.
    xn = jnp.concatenate([x, refined_noise], axis=1).astype(mxu_dtype)
    xn = jnp.pad(xn, ((0, 0), (0, C_pad - C), (2, 2), (0, 0)))
    xn_flat = xn.reshape(N, C_pad, Lp)
    if Lp_pad != Lp:
        xn_flat = jnp.pad(xn_flat, ((0, 0), (0, 0), (0, Lp_pad - Lp)))

    # Fused weight as a single aligned 2-D (2*Cout, 9*C_pad) matrix.
    # Rows [0:Cout] = conv (zero over noise/pad channels), rows [Cout:] = gate.
    # Column order (kh, kw, c) matches the im2col slab row order.
    w_conv_ext = jnp.pad(w_conv, ((0, 0), (0, C_pad - Cin), (0, 0), (0, 0)))
    w_gate_ext = jnp.pad(w_gate, ((0, 0), (0, C_pad - C), (0, 0), (0, 0)))
    w_fused = jnp.concatenate([w_conv_ext, w_gate_ext], axis=0)  # (2Cout,Cp,3,3)
    w_fused = jnp.transpose(w_fused, (0, 2, 3, 1)).reshape(2 * Cout, K)
    w_fused = w_fused.astype(mxu_dtype)

    b_fused = jnp.concatenate([b_conv, b_gate]).reshape(2 * Cout, 1)
    b_fused = b_fused.astype(jnp.float32)

    # 0/1 lane masks (exact in bf16) emulating the width zero-padding.
    col = jnp.arange(HW, dtype=jnp.int32) % W
    masks = jnp.stack([(col != 0), (col != W - 1)]).astype(mxu_dtype)

    kernel = _make_gated_conv_kernel(W, C_pad, HW, NB)

    flops = 2 * N * (2 * Cout) * (9 * C) * HW
    bytes_accessed = (N * C_pad * Lp_pad * itemsize       # activations
                      + 2 * Cout * K * itemsize           # fused weight
                      + 2 * Cout * 4 + 2 * HW * itemsize  # bias + masks
                      + N * Cout * HW * 4)                # output
    cost = pl.CostEstimate(flops=flops, transcendentals=N * Cout * HW,
                           bytes_accessed=bytes_accessed)

    out_flat = pl.pallas_call(
        kernel,
        out_shape=jax.ShapeDtypeStruct((N, Cout, HW), jnp.float32),
        grid_spec=pltpu.PrefetchScalarGridSpec(
            num_scalar_prefetch=0,
            grid=grid,
            in_specs=[
                pl.BlockSpec((NB, C_pad, Lp_pad), lambda b: (b, 0, 0)),
                pl.BlockSpec((2 * Cout, K), lambda b: (0, 0)),
                pl.BlockSpec((2 * Cout, 1), lambda b: (0, 0)),
                pl.BlockSpec((2, HW), lambda b: (0, 0)),
            ],
            out_specs=pl.BlockSpec((NB, Cout, HW), lambda b: (b, 0, 0)),
            scratch_shapes=[pltpu.VMEM((K, NB * HW), mxu_dtype)],
        ),
        compiler_params=pltpu.CompilerParams(
            dimension_semantics=("parallel",)),
        cost_estimate=cost,
    )(xn_flat, w_fused, b_fused, masks)

    # TODO(synk): for large H*W with many channels, add a height-tiled grid axis
    # (2-row halo) + explicit vmem_limit_bytes; the whole-image block hits v7x's
    # 64 MiB VMEM ~2x sooner than v5e/v6e.

    # Metadata-only reshape back to the PyTorch output layout.
    return out_flat.reshape(N, Cout, H, W)


def _reference(x, noise, w_conv, b_conv, w_gate, b_gate):
    def conv(inp, w, b):
        out = jax.lax.conv_general_dilated(
            inp, w, window_strides=(1, 1), padding=((1, 1), (1, 1)),
            dimension_numbers=("NCHW", "OIHW", "NCHW"),
            precision=jax.lax.Precision.HIGHEST)
        return out + b[None, :, None, None]

    cat = jnp.concatenate([x, noise], axis=1)
    return conv(x, w_conv, b_conv) * jax.nn.sigmoid(conv(cat, w_gate, b_gate))


if __name__ == "__main__":
    key = jax.random.PRNGKey(0)
    k1, k2, k3, k4, k5, k6 = jax.random.split(key, 6)

    N, Cin, H, W = 2, 4, 16, 16
    Cn = 3          # "channels" arg of the module (refined_noise channels)
    Cout = 4

    x = jax.random.normal(k1, (N, Cin, H, W), jnp.float32)
    refined_noise = jax.random.normal(k2, (N, Cn, H, W), jnp.float32)

    # Deterministic parameter init (PyTorch-like uniform fan-in scaling).
    def uni(k, shape, fan_in):
        bound = 1.0 / jnp.sqrt(fan_in)
        return jax.random.uniform(k, shape, jnp.float32, -bound, bound)

    w_conv = uni(k3, (Cout, Cin, 3, 3), Cin * 9)
    b_conv = uni(k4, (Cout,), Cin * 9)
    w_gate = uni(k5, (Cout, Cin + Cn, 3, 3), (Cin + Cn) * 9)
    b_gate = uni(k6, (Cout,), (Cin + Cn) * 9)

    out = gated_convolution(x, refined_noise, w_conv, b_conv, w_gate, b_gate)
    out = jax.block_until_ready(out)

    # Reference computed on the same bf16-rounded MXU inputs (kernel accumulates
    # in f32), so only accumulation order / sigmoid approximation differ.
    def rt(a):
        return a.astype(jnp.bfloat16).astype(jnp.float32)

    ref = _reference(rt(x), rt(refined_noise), rt(w_conv), b_conv,
                     rt(w_gate), b_gate)

    assert out.shape == (N, Cout, H, W)
    err = float(jnp.max(jnp.abs(out - ref)))
    assert jnp.allclose(out, ref, atol=1e-3, rtol=1e-3), (
        "mismatch vs reference: max abs err = %e" % err)

    print("KERNEL_OK")
</pallas_src>

<mosaic_0001>
module attributes {stable_mosaic.version = 11 : i64} {
  func.func @kernel(%arg0: i32, %arg1: memref<1x16x384xbf16, #tpu.memory_space<vmem>>, %arg2: memref<8x144xbf16, #tpu.memory_space<vmem>>, %arg3: memref<8x1xf32, #tpu.memory_space<vmem>>, %arg4: memref<2x256xbf16, #tpu.memory_space<vmem>>, %arg5: memref<1x4x256xf32, #tpu.memory_space<vmem>>, %arg6: memref<144x256xbf16, #tpu.memory_space<vmem>>) attributes {dimension_semantics = [#tpu.dimension_semantics<parallel>], iteration_bounds = array<i64: 2>, scalar_prefetch = 0 : i64, scratch_operands = 1 : i64, tpu.core_type = #tpu.core_type<tc>, window_params = [{transform_indices = @transform_0, window_bounds = array<i64: 1, 16, 384>}, {pipeline_mode = #tpu.pipeline_mode<synchronous>, transform_indices = @transform_1, window_bounds = array<i64: 8, 144>}, {pipeline_mode = #tpu.pipeline_mode<synchronous>, transform_indices = @transform_2, window_bounds = array<i64: 8, 1>}, {pipeline_mode = #tpu.pipeline_mode<synchronous>, transform_indices = @transform_3, window_bounds = array<i64: 2, 256>}, {transform_indices = @transform_4, window_bounds = array<i64: 1, 4, 256>}]} {
    %c0 = arith.constant 0 : index
    %c0_0 = arith.constant 0 : index
    %0 = vector.load %arg4[%c0, %c0_0] : memref<2x256xbf16, #tpu.memory_space<vmem>>, vector<1x256xbf16>
    %c1 = arith.constant 1 : index
    %c0_1 = arith.constant 0 : index
    %1 = vector.load %arg4[%c1, %c0_1] : memref<2x256xbf16, #tpu.memory_space<vmem>>, vector<1x256xbf16>
    %c0_2 = arith.constant 0 : index
    %c0_3 = arith.constant 0 : index
    %c15 = arith.constant 15 : index
    %2 = vector.load %arg1[%c0_2, %c0_3, %c15] : memref<1x16x384xbf16, #tpu.memory_space<vmem>>, vector<1x16x256xbf16>
    %3 = vector.shape_cast %2 : vector<1x16x256xbf16> to vector<16x256xbf16>
    %4 = vector.broadcast %0 : vector<1x256xbf16> to vector<16x256xbf16>
    %5 = arith.mulf %3, %4 : vector<16x256xbf16>
    %c0_4 = arith.constant 0 : index
    %c0_5 = arith.constant 0 : index
    %6 = vector.load %arg6[%c0_4, %c0_5] : memref<144x256xbf16, #tpu.memory_space<vmem>>, vector<16x256xbf16>
    tpu.vector_store %arg6[%c0_4, %c0_5], %5 {strides = array<i32>} : memref<144x256xbf16, #tpu.memory_space<vmem>>, vector<16x256xbf16>,
    %c0_6 = arith.constant 0 : index
    %c0_7 = arith.constant 0 : index
    %c16 = arith.constant 16 : index
    %7 = vector.load %arg1[%c0_6, %c0_7, %c16] : memref<1x16x384xbf16, #tpu.memory_space<vmem>>, vector<1x16x256xbf16>
    %8 = vector.shape_cast %7 : vector<1x16x256xbf16> to vector<16x256xbf16>
    %c16_8 = arith.constant 16 : index
    %c0_9 = arith.constant 0 : index
    %9 = vector.load %arg6[%c16_8, %c0_9] : memref<144x256xbf16, #tpu.memory_space<vmem>>, vector<16x256xbf16>
    tpu.vector_store %arg6[%c16_8, %c0_9], %8 {strides = array<i32>} : memref<144x256xbf16, #tpu.memory_space<vmem>>, vector<16x256xbf16>,
    %c0_10 = arith.constant 0 : index
    %c0_11 = arith.constant 0 : index
    %c17 = arith.constant 17 : index
    %10 = vector.load %arg1[%c0_10, %c0_11, %c17] : memref<1x16x384xbf16, #tpu.memory_space<vmem>>, vector<1x16x256xbf16>
    %11 = vector.shape_cast %10 : vector<1x16x256xbf16> to vector<16x256xbf16>
    %12 = vector.broadcast %1 : vector<1x256xbf16> to vector<16x256xbf16>
    %13 = arith.mulf %11, %12 : vector<16x256xbf16>
    %c32 = arith.constant 32 : index
    %c0_12 = arith.constant 0 : index
    %14 = vector.load %arg6[%c32, %c0_12] : memref<144x256xbf16, #tpu.memory_space<vmem>>, vector<16x256xbf16>
    tpu.vector_store %arg6[%c32, %c0_12], %13 {strides = array<i32>} : memref<144x256xbf16, #tpu.memory_space<vmem>>, vector<16x256xbf16>,
    %c0_13 = arith.constant 0 : index
    %c0_14 = arith.constant 0 : index
    %c31 = arith.constant 31 : index
    %15 = vector.load %arg1[%c0_13, %c0_14, %c31] : memref<1x16x384xbf16, #tpu.memory_space<vmem>>, vector<1x16x256xbf16>
    %16 = vector.shape_cast %15 : vector<1x16x256xbf16> to vector<16x256xbf16>
    %17 = vector.broadcast %0 : vector<1x256xbf16> to vector<16x256xbf16>
    %18 = arith.mulf %16, %17 : vector<16x256xbf16>
    %c48 = arith.constant 48 : index
    %c0_15 = arith.constant 0 : index
    %19 = vector.load %arg6[%c48, %c0_15] : memref<144x256xbf16, #tpu.memory_space<vmem>>, vector<16x256xbf16>
    tpu.vector_store %arg6[%c48, %c0_15], %18 {strides = array<i32>} : memref<144x256xbf16, #tpu.memory_space<vmem>>, vector<16x256xbf16>,
    %c0_16 = arith.constant 0 : index
    %c0_17 = arith.constant 0 : index
    %c32_18 = arith.constant 32 : index
    %20 = vector.load %arg1[%c0_16, %c0_17, %c32_18] : memref<1x16x384xbf16, #tpu.memory_space<vmem>>, vector<1x16x256xbf16>
    %21 = vector.shape_cast %20 : vector<1x16x256xbf16> to vector<16x256xbf16>
    %c64 = arith.constant 64 : index
    %c0_19 = arith.constant 0 : index
    %22 = vector.load %arg6[%c64, %c0_19] : memref<144x256xbf16, #tpu.memory_space<vmem>>, vector<16x256xbf16>
    tpu.vector_store %arg6[%c64, %c0_19], %21 {strides = array<i32>} : memref<144x256xbf16, #tpu.memory_space<vmem>>, vector<16x256xbf16>,
    %c0_20 = arith.constant 0 : index
    %c0_21 = arith.constant 0 : index
    %c33 = arith.constant 33 : index
    %23 = vector.load %arg1[%c0_20, %c0_21, %c33] : memref<1x16x384xbf16, #tpu.memory_space<vmem>>, vector<1x16x256xbf16>
    %24 = vector.shape_cast %23 : vector<1x16x256xbf16> to vector<16x256xbf16>
    %25 = vector.broadcast %1 : vector<1x256xbf16> to vector<16x256xbf16>
    %26 = arith.mulf %24, %25 : vector<16x256xbf16>
    %c80 = arith.constant 80 : index
    %c0_22 = arith.constant 0 : index
    %27 = vector.load %arg6[%c80, %c0_22] : memref<144x256xbf16, #tpu.memory_space<vmem>>, vector<16x256xbf16>
    tpu.vector_store %arg6[%c80, %c0_22], %26 {strides = array<i32>} : memref<144x256xbf16, #tpu.memory_space<vmem>>, vector<16x256xbf16>,
    %c0_23 = arith.constant 0 : index
    %c0_24 = arith.constant 0 : index
    %c47 = arith.constant 47 : index
    %28 = vector.load %arg1[%c0_23, %c0_24, %c47] : memref<1x16x384xbf16, #tpu.memory_space<vmem>>, vector<1x16x256xbf16>
    %29 = vector.shape_cast %28 : vector<1x16x256xbf16> to vector<16x256xbf16>
    %30 = vector.broadcast %0 : vector<1x256xbf16> to vector<16x256xbf16>
    %31 = arith.mulf %29, %30 : vector<16x256xbf16>
    %c96 = arith.constant 96 : index
    %c0_25 = arith.constant 0 : index
    %32 = vector.load %arg6[%c96, %c0_25] : memref<144x256xbf16, #tpu.memory_space<vmem>>, vector<16x256xbf16>
    tpu.vector_store %arg6[%c96, %c0_25], %31 {strides = array<i32>} : memref<144x256xbf16, #tpu.memory_space<vmem>>, vector<16x256xbf16>,
    %c0_26 = arith.constant 0 : index
    %c0_27 = arith.constant 0 : index
    %c48_28 = arith.constant 48 : index
    %33 = vector.load %arg1[%c0_26, %c0_27, %c48_28] : memref<1x16x384xbf16, #tpu.memory_space<vmem>>, vector<1x16x256xbf16>
    %34 = vector.shape_cast %33 : vector<1x16x256xbf16> to vector<16x256xbf16>
    %c112 = arith.constant 112 : index
    %c0_29 = arith.constant 0 : index
    %35 = vector.load %arg6[%c112, %c0_29] : memref<144x256xbf16, #tpu.memory_space<vmem>>, vector<16x256xbf16>
    tpu.vector_store %arg6[%c112, %c0_29], %34 {strides = array<i32>} : memref<144x256xbf16, #tpu.memory_space<vmem>>, vector<16x256xbf16>,
    %c0_30 = arith.constant 0 : index
    %c0_31 = arith.constant 0 : index
    %c49 = arith.constant 49 : index
    %36 = vector.load %arg1[%c0_30, %c0_31, %c49] : memref<1x16x384xbf16, #tpu.memory_space<vmem>>, vector<1x16x256xbf16>
    %37 = vector.shape_cast %36 : vector<1x16x256xbf16> to vector<16x256xbf16>
    %38 = vector.broadcast %1 : vector<1x256xbf16> to vector<16x256xbf16>
    %39 = arith.mulf %37, %38 : vector<16x256xbf16>
    %c128 = arith.constant 128 : index
    %c0_32 = arith.constant 0 : index
    %40 = vector.load %arg6[%c128, %c0_32] : memref<144x256xbf16, #tpu.memory_space<vmem>>, vector<16x256xbf16>
    tpu.vector_store %arg6[%c128, %c0_32], %39 {strides = array<i32>} : memref<144x256xbf16, #tpu.memory_space<vmem>>, vector<16x256xbf16>,
    %c0_33 = arith.constant 0 : index
    %c0_34 = arith.constant 0 : index
    %41 = vector.load %arg2[%c0_33, %c0_34] : memref<8x144xbf16, #tpu.memory_space<vmem>>, vector<8x144xbf16>
    %c0_35 = arith.constant 0 : index
    %c0_36 = arith.constant 0 : index
    %42 = vector.load %arg6[%c0_35, %c0_36] : memref<144x256xbf16, #tpu.memory_space<vmem>>, vector<144x256xbf16>
    %cst = arith.constant dense<0.000000e+00> : vector<8x256xf32>
    %43 = tpu.matmul %41, %42, %cst {dimension_numbers = #tpu.dot_dimension_numbers<[1], [0], [0], [1], [0, 0, 1, 1], [], []>} : vector<8x144xbf16>, vector<144x256xbf16>, vector<8x256xf32> -> vector<8x256xf32>
    %c0_37 = arith.constant 0 : index
    %c0_38 = arith.constant 0 : index
    %44 = vector.load %arg3[%c0_37, %c0_38] : memref<8x1xf32, #tpu.memory_space<vmem>>, vector<8x1xf32>
    %45 = vector.broadcast %44 : vector<8x1xf32> to vector<8x256xf32>
    %46 = arith.addf %43, %45 : vector<8x256xf32>
    %47 = vector.extract_strided_slice %46 {offsets = [0, 0], sizes = [4, 256], strides = [1, 1]} : vector<8x256xf32> to vector<4x256xf32>
    %48 = vector.extract_strided_slice %46 {offsets = [4, 0], sizes = [4, 256], strides = [1, 1]} : vector<8x256xf32> to vector<4x256xf32>
    %49 = arith.negf %48 : vector<4x256xf32>
    %50 = math.exp %49 : vector<4x256xf32>
    %cst_39 = arith.constant 1.000000e+00 : f32
    %51 = vector.broadcast %cst_39 : f32 to vector<4x256xf32>
    %52 = arith.addf %51, %50 : vector<4x256xf32>
    %53 = arith.divf %51, %52 : vector<4x256xf32>
    %54 = arith.mulf %47, %53 : vector<4x256xf32>
    %c0_40 = arith.constant 0 : index
    %c0_41 = arith.constant 0 : index
    %c0_42 = arith.constant 0 : index
    %55 = vector.load %arg5[%c0_40, %c0_41, %c0_42] : memref<1x4x256xf32, #tpu.memory_space<vmem>>, vector<1x4x256xf32>
    %56 = vector.shape_cast %55 : vector<1x4x256xf32> to vector<4x256xf32>
    %57 = vector.shape_cast %54 : vector<4x256xf32> to vector<1x4x256xf32>
    tpu.vector_store %arg5[%c0_40, %c0_41, %c0_42], %57 {strides = array<i32>} : memref<1x4x256xf32, #tpu.memory_space<vmem>>, vector<1x4x256xf32>,
    return
  }
  func.func @transform_0(%arg0: i32) -> (i32, i32, i32) {
    %c0_i32 = arith.constant 0 : i32
    %c0_i32_0 = arith.constant 0 : i32
    %c0_i32_1 = arith.constant 0 : i32
    return %arg0, %c0_i32, %c0_i32_0 : i32, i32, i32
  }
  func.func @transform_1(%arg0: i32) -> (i32, i32) {
    %c0_i32 = arith.constant 0 : i32
    %c0_i32_0 = arith.constant 0 : i32
    %c0_i32_1 = arith.constant 0 : i32
    return %c0_i32, %c0_i32_0 : i32, i32
  }
  func.func @transform_2(%arg0: i32) -> (i32, i32) {
    %c0_i32 = arith.constant 0 : i32
    %c0_i32_0 = arith.constant 0 : i32
    %c0_i32_1 = arith.constant 0 : i32
    return %c0_i32, %c0_i32_0 : i32, i32
  }
  func.func @transform_3(%arg0: i32) -> (i32, i32) {
    %c0_i32 = arith.constant 0 : i32
    %c0_i32_0 = arith.constant 0 : i32
    %c0_i32_1 = arith.constant 0 : i32
    return %c0_i32, %c0_i32_0 : i32, i32
  }
  func.func @transform_4(%arg0: i32) -> (i32, i32, i32) {
    %c0_i32 = arith.constant 0 : i32
    %c0_i32_0 = arith.constant 0 : i32
    %c0_i32_1 = arith.constant 0 : i32
    return %arg0, %c0_i32, %c0_i32_0 : i32, i32, i32
  }
}

</mosaic_0001>

<bundles_post_ra>
// kernel: gated_convolution.1
= control target key start
LH: loop header
LB: loop body
LE: loop exit
PB: predicated region body
PF: predicated region fallthrough
CT: control target
= control target key end

     0   :  { %s1144_s15 = smov 0   ;;  %s1335_s0 = inlined_call_operand.vmem [shape: bf16[2,16,384], index: 0, kind: input, shape index: {}]   ;;  %s1336_s1 = inlined_call_operand.vmem [shape: bf16[8,144], index: 1, kind: input, shape index: {}]   ;;  %s1337_s2 = inlined_call_operand.vmem [shape: f32[8,1], index: 2, kind: input, shape index: {}]   ;;  %s1338_s3 = inlined_call_operand.vmem [shape: bf16[2,256], index: 3, kind: input, shape index: {}]   ;;  %s1339_s4 = inlined_call_operand.vmem [shape: f32[2,4,256], index: 4, kind: output, shape index: {}]  }
   0x1 LB: > { %s926_s16 = sadd.s32 4294967295, %s1101_s15   ;;  %p930_p0 = scmp.ge.s32.totalorder %s1101_s15, 1  ;;  %s1101_s15 = sphi %s1144_s15, %s14_s15  }
   0x2   : > { %p162_p1 = scmp.lt.s32.totalorder %s1101_s15, 3 }
   0x4   : > { %p163_p2 = pnand %p930_p0, %p162_p1 }
   0x5   : > { %p188_p3 = scmp.lt.s32.totalorder (!%p163_p2), %s926_s16, 1  ;;  %s1103_s23 = smov (!%p163_p2), 80  }
   0x6   : > { %166 = sbr.rel (%p163_p2) target bundleno = 516 (0x204), region = 36  ;;  %s1104_s24 = smov (!%p163_p2), 47  }
   0x7   : > { %s1105_s25 = smov (!%p163_p2), 31   ;;  %s1106_s26 = smov (!%p163_p2), 15  }
   0x8   : > { %s1107_s27 = smov (!%p163_p2), 96   ;;  %s1108_s28 = smov (!%p163_p2), 33  }
   0x9   : > { %s1109_s29 = smov (!%p163_p2), 17   ;;  %s1110_s30 = smov (!%p163_p2), 49  }
   0xa   : > { %s1111_s5 = smov (!%p163_p2), 112   ;;  %s1112_s6 = smov (!%p163_p2), 81  }
   0xb   : > { %v199_v0 = vld [vmem:[%s1338_s3] sm:$0x3]  ;;  %s1341_s16 = smov (!%p188_p3, %s926_s16), 1  ;;  %vm259_vm0 = vcmask 1043456   ;;  %vm579_vm1 = vcmask 654336   ;;  %vm518_vm2 = vcmask 384000  }
   0xc   : > { %205 = vst [vmem:[#allocation1] ss:$9 sm:$0xff] %v199_v0  ;;  %s1031_s19 = smul.u32 24, %s1341_s16  ;;  %vm381_vm3 = vcmask 252928   ;;  %s1113_s7 = smov 97   ;;  %vm442_vm4 = vcmask 785408  }
   0xd   : > { %s1114_s8 = smov 113   ;;  %s1115_s9 = smov 95   ;;  %vm228_vm5 = vcmask 121856   ;;  %vm601_vm6 = vcmask 400384   ;;  %vm464_vm7 = vcmask 269312   ;;  %vm327_vm8 = vcmask 138240  }
   0xe   : > { %s1161_s22 = scalar_lea.vmem %s1335_s0, %s1031_s19  ;;  %s1116_s10 = smov 111   ;;  %vm290_vm9 = vcmask 916480   ;;  %vm550_vm10 = vcmask 662528   ;;  %vm413_vm11 = vcmask 793600   ;;  %vm496_vm12 = vcmask 777216  }
   0xf   : > { %v559_v1 = vld [vmem:[%s1161_s22 + $0x8] sm:$0xf]  ;;  %v1165_v2 = vld [vmem:[%s1161_s22] sm:$0xff]  ;;  %v1171_v7 = vld [vmem:[%s1161_s22 + $0xc] sm:$0xff]  ;;  %s1117_s11 = smov 79   ;;  %vm359_vm13 = vcmask 908288  }
  0x10   : > { %568 = vrot.lane.b32.xlu1 %v559_v1, %s1103_s23  ;;  %566 = vrot.lane.b32.xlu0 %v1165_v2, %s1103_s23  ;;  %v561_v21 = vld [vmem:[%s1161_s22 + $0x14] sm:$0xf]  ;;  %v422_v22 = vld [vmem:[%s1161_s22 + $0x8] sm:$0xf]  ;;  %v1191_v43 = vunpack.c.l.bf16 %v1171_v7  ;;  %v1194_v44 = vunpack.c.h.bf16 %v1171_v7  ;;  %vm261_vm14 = vcmask 924672   ;;  %vm633_vm15 = vcmask 646144  }
  0x11   : > { %570 = vrot.lane.b32.xlu2 %v1171_v7, %s1103_s23  ;;  %v424_v26 = vld [vmem:[%s1161_s22 + $0x14] sm:$0xf]  ;;  %v270_v27 = vld [vmem:[%s1161_s22 + $0x8] sm:$0xf]  ;;  %s1012_s18 = sshll.u32 %s1341_s16, 3 }
  0x12   : > { %v272_v28 = vld [vmem:[%s1161_s22 + $0x14] sm:$0xf]  ;;  %v505_v35 = vld [vmem:[%s1161_s22 + $0x8] sm:$0xf]  ;;  %s197_s21 = scalar_lea.vmem %s1339_s4, %s1012_s18 }
  0x13   : > { %v206_v3 = vld [vmem:[#allocation1] sm:$0xff]  ;;  %v207_v4 = vld [vmem:[#allocation1 + $0x9] sm:$0xff]  ;;  %v507_v36 = vld [vmem:[%s1161_s22 + $0x14] sm:$0xf]  ;;  %v510_v37 = vunpack.c.l.bf16 %v505_v35 }
  0x14   : > { %v208_v5 = vpack.i.b16 %v206_v3, %v206_v3  ;;  %v211_v6 = vpack.i.b16 %v207_v4, %v207_v4  ;;  %302 = vst [vmem:[#allocation1] ss:$9 sm:$0xff] %v199_v0  ;;  %v513_v38 = vunpack.c.l.bf16 %v507_v36  ;;  %v368_v40 = vld [vmem:[%s1161_s22 + $0x8] sm:$0xf]  ;;  %v370_v45 = vld [vmem:[%s1161_s22 + $0x14] sm:$0xf] }
  0x15   : > { %v373_v50 = vunpack.c.l.bf16 %v368_v40  ;;  %v376_v54 = vunpack.c.l.bf16 %v370_v45 }
  0x16   : > { %v210_v8 = vperm.slane %v208_v5, 0  ;;  %v213_v9 = vperm.slane %v211_v6, 0 }
  0x18   : > { %v220_v10 = vunpack.c.l.bf16 %v210_v8  ;;  %v221_v11 = vunpack.c.l.bf16 %v213_v9 }
  0x1a   : > { %v1056_v12 = vpack.i.bf16 %v221_v11, %v220_v10 }
  0x1b   : > { %v303_v13 = vld [vmem:[#allocation1] sm:$0xff]  ;;  %v304_v14 = vld [vmem:[#allocation1 + $0x9] sm:$0xff] }
  0x1c   : > { %1057 = vrot.lane.b32.xlu0 %v1056_v12, %s1104_s24  ;;  %1062 = vrot.lane.b32.xlu1 %v1056_v12, %s1105_s25  ;;  %v305_v15 = vshrl.u32 %v303_v13, 16  ;;  %v309_v16 = vshrl.u32 %v304_v14, 16 }
  0x1d   : > { %1067 = vrot.lane.b32.xlu2 %v1056_v12, %s1106_s26 }
  0x1e   : > { %v306_v17 = vpack.i.b16 %v305_v15, %v305_v15  ;;  %v310_v18 = vpack.i.b16 %v309_v16, %v309_v16  ;;  %v451_v15 = vld [vmem:[%s1161_s22 + $0x8] sm:$0xf]  ;;  %v1218_v16 = vunpack.c.l.bf16 %v1165_v2 }
  0x20   : > { %v308_v19 = vperm.slane %v306_v17, 0  ;;  %v312_v20 = vperm.slane %v310_v18, 0  ;;  %v1221_v17 = vunpack.c.h.bf16 %v1165_v2  ;;  %v456_v18 = vunpack.c.l.bf16 %v451_v15 }
  0x22   : > { %v319_v23 = vunpack.c.l.bf16 %v308_v19  ;;  %v320_v24 = vunpack.c.l.bf16 %v312_v20 }
  0x24   : > { %572 = vrot.lane.b32.xlu0 %v561_v21, %s1103_s23  ;;  %431 = vrot.lane.b32.xlu1 %v422_v22, %s1107_s27  ;;  %v1071_v25 = vpack.i.bf16 %v320_v24, %v319_v23  ;;  %v453_v22 = vld [vmem:[%s1161_s22 + $0x14] sm:$0xf]  ;;  %v299_v23 = vld [vmem:[%s1161_s22 + $0x8] sm:$0xf] }
  0x25   : > { %433 = vrot.lane.b32.xlu2 %v1171_v7, %s1107_s27 }
  0x2c   : > { %1072 = vrot.lane.b32.xlu0 %v1071_v25, %s1108_s28  ;;  %1077 = vrot.lane.b32.xlu1 %v1071_v25, %s1109_s29 }
  0x2d   : > { %1082 = vrot.lane.b32.xlu2 %v1071_v25, %s1110_s30 }
  0x34   : > { %429 = vrot.lane.b32.xlu0 %v1165_v2, %s1107_s27  ;;  %279 = vrot.lane.b32.xlu1 %v270_v27, %s1111_s5 }
  0x35   : > { %281 = vrot.lane.b32.xlu2 %v1171_v7, %s1111_s5  ;;  %v201_v7 = vld [vmem:[%s1161_s22 + $0x8] sm:$0xf] }
  0x36   : > { %v216_v14 = vunpack.c.l.bf16 %v201_v7 }
  0x3c   : > { %435 = vrot.lane.b32.xlu0 %v424_v26, %s1107_s27 }
  0x44   : > { %277 = vrot.lane.b32.xlu0 %v1165_v2, %s1111_s5 }
  0x4c   : > { %283 = vrot.lane.b32.xlu0 %v272_v28, %s1111_s5 }
  0x6b   : > { %v571_v39 = vpop.permute.xlu2 %570 }
  0x6c   : > { %v576_v61 = vrot.slane %v571_v39, 4 }
  0x77   : > { %v1068_v6 = vpop.permute.xlu2 %1067 }
  0x78   : > { %v1214_v12 = vunpack.i.h.bf16 %v1068_v6  ;;  %v1069_v45 = vunpack.i.l.bf16 %v1068_v6 }
  0x7a   : > { %v235_v20 = vmul.f32 %v1214_v12, %v216_v14  ;;  %v236_v7 = vmul.f32 %v1069_v45, %v1191_v43 }
  0x82   : > { %v569_v29 = vpop.permute.xlu1 %568  ;;  %v567_v30 = vpop.permute.xlu0 %566 }
  0x83   : > { %v575_v31 = vrot.slane %v569_v29, 4  ;;  %v574_v32 = vrot.slane %v567_v30, 4 }
  0x85   : > { %v578_v33 = vsel %vm259_vm0, %v574_v32, %v575_v31  ;;  %v240_v31 = vpack.c.bf16 %v235_v20, %v235_v20  ;;  %v459_v32 = vunpack.c.l.bf16 %v453_v22 }
  0x86   : > { %v580_v34 = vsel %vm579_vm1, %v567_v30, %v578_v33  ;;  %v315_v33 = vunpack.c.l.bf16 %v299_v23 }
  0x87   : > { %585 = vst [vmem:[#allocation2 + $0x70] sm:$0xff] %v580_v34 }
  0x8e   : > { %v1058_v41 = vpop.permute.xlu0 %1057  ;;  %v1063_v42 = vpop.permute.xlu1 %1062  ;;  %v992_v26 = vld [vmem:[#allocation2 + $0x70] sm:$0xf]  ;;  %v1027_v29 = vld [vmem:[#allocation2 + $0x74] sm:$0xf] }
  0x8f   : > { %v1060_v46 = vunpack.i.h.bf16 %v1058_v41  ;;  %v1059_v47 = vunpack.i.l.bf16 %v1058_v41  ;;  %v1065_v48 = vunpack.i.h.bf16 %v1063_v42  ;;  %v1197_v49 = vunpack.i.l.bf16 %v1063_v42 }
  0x91   : > { %v519_v51 = vsel %vm518_vm2, %v1059_v47, %v1060_v46  ;;  %v525_v52 = vmul.f32 %v1060_v46, %v510_v37  ;;  %v528_v53 = vmul.f32 %v1060_v46, %v513_v38  ;;  %v526_v55 = vmul.f32 %v1059_v47, %v1191_v43  ;;  %v434_v38 = vpop.permute.xlu2 %433 }
  0x92   : > { %v527_v56 = vmul.f32 %v519_v51, %v1194_v44  ;;  %v1202_v57 = vsel %vm381_vm3, %v1197_v49, %v1065_v48  ;;  %v388_v62 = vmul.f32 %v1065_v48, %v373_v50  ;;  %v391_v63 = vmul.f32 %v1065_v48, %v376_v54  ;;  %v301_v48 = vld [vmem:[%s1161_s22 + $0x14] sm:$0xf] }
  0x93   : > { %v530_v58 = vpack.c.bf16 %v525_v52, %v525_v52  ;;  %v532_v59 = vpack.c.bf16 %v528_v53, %v528_v53  ;;  %v389_v1 = vmul.f32 %v1197_v49, %v1191_v43  ;;  %v390_v3 = vmul.f32 %v1194_v44, %v1202_v57 }
  0x94   : > { %v531_v60 = vpack.c.bf16 %v527_v56, %v526_v55  ;;  %v393_v9 = vpack.c.bf16 %v388_v62, %v388_v62  ;;  %v395_v10 = vpack.c.bf16 %v391_v63, %v391_v63  ;;  %v523_v24 = vmul.f32 %v1059_v47, %v1218_v16 }
  0x95   : > { %539 = vrot.lane.b32.xlu2 %v530_v58, %s1112_s6  ;;  %543 = vrot.lane.b32.xlu1 %v532_v59, %s1112_s6  ;;  %v394_v13 = vpack.c.bf16 %v390_v3, %v389_v1  ;;  %v524_v2 = vmul.f32 %v519_v51, %v1221_v17  ;;  %v386_v50 = vmul.f32 %v1197_v49, %v1218_v16  ;;  %v318_v55 = vunpack.c.l.bf16 %v301_v48 }
  0x96   : > { %v573_v0 = vpop.permute.xlu0 %572  ;;  %541 = vrot.lane.b32.xlu0 %v531_v60, %s1112_s6  ;;  %v432_v4 = vpop.permute.xlu1 %431  ;;  %v387_v51 = vmul.f32 %v1221_v17, %v1202_v57  ;;  %v229_v56 = vsel %vm228_vm5, %v1069_v45, %v1214_v12  ;;  %v439_v60 = vrot.slane %v434_v38, 4  ;;  %v233_v62 = vmul.f32 %v1069_v45, %v1218_v16 }
  0x97   : > { %v577_v5 = vrot.slane %v573_v0, 4  ;;  %v438_v40 = vrot.slane %v432_v4, 4  ;;  %v234_v63 = vmul.f32 %v1221_v17, %v229_v56 }
  0x98   : > { %v392_v59 = vpack.c.bf16 %v387_v51, %v386_v50 }
  0x99   : > { %v581_v8 = vsel %vm259_vm0, %v576_v61, %v577_v5  ;;  %v1083_v61 = vpop.permute.xlu2 %1082  ;;  %v588_v5 = vld [vmem:[%s1161_s22 + $0x8] sm:$0xf] }
  0x9a   : > { %v582_v11 = vsel %vm579_vm1, %v571_v39, %v581_v8  ;;  %v529_v39 = vpack.c.bf16 %v524_v2, %v523_v24  ;;  %v1084_v0 = vunpack.i.l.bf16 %v1083_v61  ;;  %v1085_v4 = vunpack.i.h.bf16 %v1083_v61 }
  0x9b   : > { %586 = vst [vmem:[#allocation2 + $0x78] sm:$0xff] %v582_v11  ;;  %v237_v8 = vmul.f32 %v1194_v44, %v229_v56  ;;  %v239_v11 = vpack.c.bf16 %v234_v63, %v233_v62  ;;  %v593_v15 = vunpack.c.l.bf16 %v588_v5  ;;  %vm762_vm1 = vcmask 130048  }
  0x9d   : > { %402 = vrot.lane.b32.xlu2 %v393_v9, %s1113_s7  ;;  %406 = vrot.lane.b32.xlu1 %v395_v10, %s1113_s7  ;;  %v241_v20 = vpack.c.bf16 %v237_v8, %v236_v7 }
  0x9e   : > { %404 = vrot.lane.b32.xlu0 %v394_v13, %s1113_s7  ;;  %v1073_v19 = vpop.permute.xlu0 %1072  ;;  %v1233_v25 = vpop.permute.xlu1 %1077  ;;  %v602_v13 = vsel %vm601_vm6, %v1084_v0, %v1085_v4 }
  0x9f   : > { %v1227_v21 = vunpack.i.h.bf16 %v1073_v19  ;;  %v1237_v37 = vunpack.i.h.bf16 %v1233_v25  ;;  %v1074_v1 = vunpack.i.l.bf16 %v1073_v19  ;;  %v610_v19 = vmul.f32 %v602_v13, %v1194_v44 }
  0xa1   : > { %v471_v27 = vmul.f32 %v1227_v21, %v456_v18  ;;  %v474_v42 = vmul.f32 %v1227_v21, %v459_v32  ;;  %v334_v47 = vmul.f32 %v1237_v37, %v315_v33  ;;  %v337_v57 = vmul.f32 %v1237_v37, %v318_v55  ;;  %v282_v50 = vpop.permute.xlu2 %281 }
  0xa2   : > { %v1028_v28 = vld [vmem:[#allocation2 + $0x74] sm:$0xf0]  ;;  %v994_v30 = vld [vmem:[#allocation2 + $0x78] sm:$0xf0]  ;;  %v465_v14 = vsel %vm464_vm7, %v1074_v1, %v1227_v21  ;;  %v609_v18 = vmul.f32 %v1084_v0, %v1191_v43  ;;  %v469_v22 = vmul.f32 %v1074_v1, %v1218_v16  ;;  %v472_v2 = vmul.f32 %v1074_v1, %v1191_v43 }
  0xa3   : > { %v993_v34 = vor.u32 %v1028_v28, %v992_v26  ;;  %v997_v35 = vor.u32 %v1027_v29, %v994_v30  ;;  %v476_v36 = vpack.c.bf16 %v471_v27, %v471_v27  ;;  %v478_v54 = vpack.c.bf16 %v474_v42, %v474_v42 }
  0xa4   : > { %v339_v58 = vpack.c.bf16 %v334_v47, %v334_v47  ;;  %v341_v10 = vpack.c.bf16 %v337_v57, %v337_v57  ;;  %v614_v23 = vpack.c.bf16 %v610_v19, %v609_v18  ;;  %v470_v24 = vmul.f32 %v1221_v17, %v465_v14 }
  0xa5   : > { %766 = vmatpush.bf16.msra.mxu0 %v993_v34  ;;  %792 = vmatpush.bf16.msra.mxu2 %v997_v35  ;;  %v473_v21 = vmul.f32 %v1194_v44, %v465_v14  ;;  %v1079_v26 = vunpack.i.l.bf16 %v1233_v25  ;;  %v608_v27 = vmul.f32 %v1085_v4, %v593_v15  ;;  %v203_v35 = vld [vmem:[%s1161_s22 + $0x14] sm:$0xf]  ;;  %v287_v51 = vrot.slane %v282_v50, 4 }
  0xa6   : > { %537 = vrot.lane.b32.xlu1 %v529_v39, %s1112_s6  ;;  %249 = vrot.lane.b32.xlu2 %v240_v31, %s1114_s8  ;;  %v430_v41 = vpop.permute.xlu0 %429  ;;  %v475_v28 = vpack.c.bf16 %v470_v24, %v469_v22  ;;  %v606_v39 = vmul.f32 %v1084_v0, %v1218_v16 }
  0xa7   : > { %485 = vrot.lane.b32.xlu0 %v476_v36, %s1115_s9  ;;  %v437_v46 = vrot.slane %v430_v41, 4  ;;  %v477_v29 = vpack.c.bf16 %v473_v21, %v472_v2  ;;  %v328_v30 = vsel %vm327_vm8, %v1079_v26, %v1237_v37  ;;  %v613_v31 = vpack.c.bf16 %v608_v27, %v608_v27 }
  0xa8   : > { %v332_v32 = vmul.f32 %v1079_v26, %v1218_v16  ;;  %v333_v33 = vmul.f32 %v1221_v17, %v328_v30  ;;  %v335_v25 = vmul.f32 %v1079_v26, %v1191_v43  ;;  %v336_v34 = vmul.f32 %v1194_v44, %v328_v30  ;;  %v280_v16 = vpop.permute.xlu1 %279 }
  0xa9   : > { %v441_v52 = vsel %vm259_vm0, %v437_v46, %v438_v40  ;;  %v219_v37 = vunpack.c.l.bf16 %v203_v35  ;;  %v607_v40 = vmul.f32 %v602_v13, %v1221_v17  ;;  %v286_v17 = vrot.slane %v280_v16, 4 }
  0xaa   : > { %v443_v53 = vsel %vm442_vm4, %v430_v41, %v441_v52  ;;  %v338_v36 = vpack.c.bf16 %v333_v33, %v332_v32  ;;  %v590_v41 = vld [vmem:[%s1161_s22 + $0x14] sm:$0xf] }
  0xab   : > { %448 = vst [vmem:[#allocation2 + $0x40] sm:$0xff] %v443_v53  ;;  %v238_v42 = vmul.f32 %v1214_v12, %v219_v37  ;;  %v612_v43 = vpack.c.bf16 %v607_v40, %v606_v39  ;;  %v596_v45 = vunpack.c.l.bf16 %v590_v41 }
  0xad   : > { %v242_v44 = vpack.c.bf16 %v238_v42, %v238_v42  ;;  %v611_v46 = vmul.f32 %v1085_v4, %v596_v45 }
  0xae   : > { %400 = vrot.lane.b32.xlu1 %v392_v59, %s1113_s7  ;;  %489 = vrot.lane.b32.xlu2 %v478_v54, %s1115_s9  ;;  %v436_v49 = vpop.permute.xlu0 %435 }
  0xaf   : > { %348 = vrot.lane.b32.xlu0 %v339_v58, %s1116_s10  ;;  %v440_v3 = vrot.slane %v436_v49, 4  ;;  %v615_v47 = vpack.c.bf16 %v611_v46, %v611_v46 }
  0xb1   : > { %v444_v6 = vsel %vm259_vm0, %v439_v60, %v440_v3 }
  0xb2   : > { %v445_v9 = vsel %vm442_vm4, %v434_v38, %v444_v6  ;;  %v340_v38 = vpack.c.bf16 %v336_v34, %v335_v25 }
  0xb3   : > { %449 = vst [vmem:[#allocation2 + $0x48] sm:$0xff] %v445_v9 }
  0xb6   : > { %352 = vrot.lane.b32.xlu2 %v341_v10, %s1116_s10  ;;  %247 = vrot.lane.b32.xlu1 %v239_v11, %s1114_s8  ;;  %v278_v48 = vpop.permute.xlu0 %277 }
  0xb7   : > { %251 = vrot.lane.b32.xlu0 %v241_v20, %s1114_s8  ;;  %v285_v52 = vrot.slane %v278_v48, 4 }
  0xb9   : > { %v289_v12 = vsel %vm259_vm0, %v285_v52, %v286_v17 }
  0xba   : > { %v291_v56 = vsel %vm290_vm9, %v278_v48, %v289_v12 }
  0xbb   : > { %296 = vst [vmem:[#allocation2 + $0x10] sm:$0xff] %v291_v56 }
  0xbe   : > { %483 = vrot.lane.b32.xlu2 %v475_v28, %s1115_s9  ;;  %487 = vrot.lane.b32.xlu1 %v477_v29, %s1115_s9  ;;  %v284_v53 = vpop.permute.xlu0 %283 }
  0xbf   : > { %622 = vrot.lane.b32.xlu0 %v613_v31, %s1117_s11  ;;  %v288_v54 = vrot.slane %v284_v53, 4 }
  0xc1   : > { %v292_v55 = vsel %vm259_vm0, %v287_v51, %v288_v54 }
  0xc2   : > { %v293_v58 = vsel %vm290_vm9, %v282_v50, %v292_v55 }
  0xc3   : > { %297 = vst [vmem:[#allocation2 + $0x18] sm:$0xff] %v293_v58 }
  0xc6   : > { %346 = vrot.lane.b32.xlu2 %v338_v36, %s1116_s10  ;;  %350 = vrot.lane.b32.xlu1 %v340_v38, %s1116_s10 }
  0xce   : > { %620 = vrot.lane.b32.xlu2 %v612_v43, %s1117_s11  ;;  %253 = vrot.lane.b32.xlu1 %v242_v44, %s1114_s8 }
  0xd6   : > { %626 = vrot.lane.b32.xlu2 %v615_v47, %s1117_s11  ;;  %624 = vrot.lane.b32.xlu1 %v614_v23, %s1117_s11 }
  0xef   : > { %v540_v59 = vpop.permute.xlu2 %539 }
  0xf0   : > { %v546_v14 = vrot.slane %v540_v59, 4 }
  0xf7   : > { %v403_v60 = vpop.permute.xlu2 %402 }
  0xf8   : > { %v409_v27 = vrot.slane %v403_v60, 4  ;;  %v660_v60 = vld [vmem:[%s1337_s2] sm:$0xff] }
 0x100   : > { %v250_v61 = vpop.permute.xlu2 %249 }
 0x101   : > { %v256_v42 = vrot.slane %v250_v61, 4 }
 0x107   : > { %v544_v49 = vpop.permute.xlu1 %543 }
 0x108   : > { %v548_v57 = vrot.slane %v544_v49, 4  ;;  %v1291_v62 = vpop.permute.xlu2 %489  ;;  %v542_v63 = vpop.permute.xlu0 %541 }
 0x109   : > { %v547_v0 = vrot.slane %v542_v63, 4  ;;  %v494_v48 = vrot.slane %v1291_v62, 4 }
 0x10b   : > { %v552_v1 = vsel %vm259_vm0, %v547_v0, %v548_v57  ;;  %v1118_v57 = vmov 0  }
 0x10c   : > { %v553_v3 = vsel %vm550_vm10, %v542_v63, %v552_v1  ;;  %1086 = vset.pattern.permute.xlu0 %v1118_v57 }
 0x10d   : > { %557 = vst [vmem:[#allocation2 + $0x68] sm:$0xff] %v553_v3  ;;  %663 = vperm.xlu0 %1086, %v660_v60  }
 0x10f   : > { %v407_v4 = vpop.permute.xlu1 %406 }
 0x110   : > { %v411_v5 = vrot.slane %v407_v4, 4  ;;  %v1295_v6 = vpop.permute.xlu2 %352  ;;  %v405_v7 = vpop.permute.xlu0 %404 }
 0x111   : > { %v410_v8 = vrot.slane %v405_v7, 4  ;;  %v357_v58 = vrot.slane %v1295_v6, 4  ;;  %v1022_v6 = vld [vmem:[#allocation2 + $0x44] sm:$0xf0] }
 0x113   : > { %v415_v9 = vsel %vm259_vm0, %v410_v8, %v411_v5  ;;  %v968_v5 = vld [vmem:[#allocation2 + $0x40] sm:$0xf]  ;;  %v970_v8 = vld [vmem:[#allocation2 + $0x48] sm:$0xf0] }
 0x114   : > { %v416_v10 = vsel %vm413_vm11, %v405_v7, %v415_v9  ;;  %v1026_v33 = vld [vmem:[#allocation2 + $0x64] sm:$0xf0]  ;;  %v986_v38 = vld [vmem:[#allocation2 + $0x68] sm:$0xf0]  ;;  %v1021_v7 = vld [vmem:[#allocation2 + $0x44] sm:$0xf] }
 0x115   : > { %420 = vst [vmem:[#allocation2 + $0x38] sm:$0xff] %v416_v10 }
 0x118   : > { %v538_v11 = vpop.permute.xlu1 %537  ;;  %v484_v13 = vpop.permute.xlu2 %483 }
 0x119   : > { %v545_v15 = vrot.slane %v538_v11, 4  ;;  %v491_v18 = vrot.slane %v484_v13, 4  ;;  %v486_v19 = vpop.permute.xlu0 %485 }
 0x11a   : > { %v492_v20 = vrot.slane %v486_v19, 4 }
 0x11b   : > { %v549_v22 = vsel %vm259_vm0, %v545_v15, %v546_v14  ;;  %v973_v14 = vor.u32 %v1021_v7, %v970_v8 }
 0x11c   : > { %v551_v23 = vsel %vm550_vm10, %v538_v11, %v549_v22  ;;  %v495_v24 = vsel %vm259_vm0, %v491_v18, %v492_v20  ;;  %v1020_v22 = vld [vmem:[#allocation2 + $0x34] sm:$0xf0] }
 0x11d   : > { %556 = vst [vmem:[#allocation2 + $0x60] sm:$0xff] %v551_v23  ;;  %v497_v2 = vsel %vm496_vm12, %v484_v13, %v495_v24  ;;  %v969_v13 = vor.u32 %v1022_v6, %v968_v5  ;;  %v962_v23 = vld [vmem:[#allocation2 + $0x38] sm:$0xf0] }
 0x11e   : > { %502 = vst [vmem:[#allocation2 + $0x50] sm:$0xff] %v497_v2 }
 0x120   : > { %v401_v21 = vpop.permute.xlu1 %400  ;;  %v347_v26 = vpop.permute.xlu2 %346 }
 0x121   : > { %v408_v28 = vrot.slane %v401_v21, 4  ;;  %v354_v29 = vrot.slane %v347_v26, 4  ;;  %v349_v30 = vpop.permute.xlu0 %348 }
 0x122   : > { %v355_v31 = vrot.slane %v349_v30, 4 }
 0x123   : > { %v412_v32 = vsel %vm259_vm0, %v408_v28, %v409_v27 }
 0x124   : > { %v414_v25 = vsel %vm413_vm11, %v401_v21, %v412_v32  ;;  %v358_v34 = vsel %vm259_vm0, %v354_v29, %v355_v31  ;;  %v984_v35 = vld [vmem:[#allocation2 + $0x60] sm:$0xf]  ;;  %v1025_v36 = vld [vmem:[#allocation2 + $0x64] sm:$0xf] }
 0x125   : > { %419 = vst [vmem:[#allocation2 + $0x30] sm:$0xff] %v414_v25  ;;  %v985_v37 = vor.u32 %v1026_v33, %v984_v35  ;;  %v989_v39 = vor.u32 %v1025_v36, %v986_v38  ;;  %v360_v40 = vsel %vm359_vm13, %v347_v26, %v358_v34  ;;  %v976_v49 = vld [vmem:[#allocation2 + $0x50] sm:$0xf]  ;;  %v1023_v0 = vld [vmem:[#allocation2 + $0x54] sm:$0xf] }
 0x126   : > { %365 = vst [vmem:[#allocation2 + $0x20] sm:$0xff] %v360_v40  ;;  %v944_v34 = vld [vmem:[#allocation2 + $0x10] sm:$0xf]  ;;  %v1016_v35 = vld [vmem:[#allocation2 + $0x14] sm:$0xf0] }
 0x127   : > { %767 = vmatpush.bf16.msra.mxu0 %v985_v37  ;;  %793 = vmatpush.bf16.msra.mxu2 %v989_v39  ;;  %v1015_v36 = vld [vmem:[#allocation2 + $0x14] sm:$0xf]  ;;  %v946_v38 = vld [vmem:[#allocation2 + $0x18] sm:$0xf0] }
 0x128   : > { %v248_v41 = vpop.permute.xlu1 %247  ;;  %v621_v50 = vpop.permute.xlu2 %620  ;;  %v641_v39 = vld [vmem:[%s1336_s1] sm:$0xff] }
 0x129   : > { %v255_v43 = vrot.slane %v248_v41, 4  ;;  %v252_v45 = vpop.permute.xlu0 %251  ;;  %v628_v16 = vrot.slane %v621_v50, 4 }
 0x12a   : > { %v257_v10 = vrot.slane %v252_v45, 4 }
 0x12b   : > { %v260_v44 = vsel %vm259_vm0, %v255_v43, %v256_v42  ;;  %v949_v42 = vor.u32 %v1015_v36, %v946_v38 }
 0x12c   : > { %v262_v46 = vsel %vm261_vm14, %v248_v41, %v260_v44  ;;  %v960_v15 = vld [vmem:[#allocation2 + $0x30] sm:$0xf]  ;;  %v1019_v18 = vld [vmem:[#allocation2 + $0x34] sm:$0xf]  ;;  %v945_v41 = vor.u32 %v1016_v35, %v944_v34  ;;  %v667_v44 = vunpack.c.l.b16 %v641_v39 }
 0x12d   : > { %267 = vst [vmem:[#allocation2] sm:$0xff] %v262_v46  ;;  %v961_v24 = vor.u32 %v1020_v22, %v960_v15  ;;  %v965_v2 = vor.u32 %v1019_v18, %v962_v23  ;;  %v952_v29 = vld [vmem:[#allocation2 + $0x20] sm:$0xf]  ;;  %v1017_v30 = vld [vmem:[#allocation2 + $0x24] sm:$0xf] }
 0x130   : > { %v488_v47 = vpop.permute.xlu1 %487  ;;  %v627_v21 = vpop.permute.xlu2 %626 }
 0x131   : > { %v493_v51 = vrot.slane %v488_v47, 4  ;;  %v623_v52 = vpop.permute.xlu0 %622  ;;  %v631_v31 = vrot.slane %v627_v21, 4 }
 0x132   : > { %v629_v53 = vrot.slane %v623_v52, 4  ;;  %v669_v52 = vpack.c.b16 %v667_v44, %v667_v44 }
 0x133   : > { %v498_v17 = vsel %vm259_vm0, %v493_v51, %v494_v48  ;;  %v668_v51 = vunpack.c.h.b16 %v641_v39 }
 0x134   : > { %v499_v54 = vsel %vm496_vm12, %v488_v47, %v498_v17  ;;  %v632_v12 = vsel %vm259_vm0, %v628_v16, %v629_v53  ;;  %v936_v46 = vld [vmem:[#allocation2] sm:$0xf]  ;;  %v1013_v47 = vld [vmem:[#allocation2 + $0x4] sm:$0xf] }
 0x135   : > { %503 = vst [vmem:[#allocation2 + $0x58] sm:$0xff] %v499_v54  ;;  %v634_v55 = vsel %vm633_vm15, %v621_v50, %v632_v12 }
 0x136   : > { %639 = vst [vmem:[#allocation2 + $0x80] sm:$0xff] %v634_v55 }
 0x138   : > { %v351_v56 = vpop.permute.xlu1 %350 }
 0x139   : > { %v356_v59 = vrot.slane %v351_v56, 4 }
 0x13b   : > { %v361_v61 = vsel %vm259_vm0, %v356_v59, %v357_v58 }
 0x13c   : > { %v362_v62 = vsel %vm359_vm13, %v351_v56, %v361_v61  ;;  %v1024_v63 = vld [vmem:[#allocation2 + $0x54] sm:$0xf0]  ;;  %v978_v1 = vld [vmem:[#allocation2 + $0x58] sm:$0xf0]  ;;  %v670_v56 = vpack.c.b16 %v668_v51, %v668_v51 }
 0x13d   : > { %366 = vst [vmem:[#allocation2 + $0x28] sm:$0xff] %v362_v62  ;;  %v977_v3 = vor.u32 %v1024_v63, %v976_v49  ;;  %v981_v4 = vor.u32 %v1023_v0, %v978_v1  ;;  %v1000_v16 = vld [vmem:[#allocation2 + $0x80] sm:$0xf]  ;;  %v1029_v17 = vld [vmem:[#allocation2 + $0x84] sm:$0xf] }
 0x13f   : > { %768 = vmatpush.bf16.msra.mxu0 %v977_v3  ;;  %794 = vmatpush.bf16.msra.mxu2 %v981_v4 }
 0x140   : > { %v254_v9 = vpop.permute.xlu1 %253 }
 0x141   : > { %v258_v11 = vrot.slane %v254_v9, 4 }
 0x143   : > { %v263_v19 = vsel %vm259_vm0, %v257_v10, %v258_v11  ;;  %769 = vmatpush.bf16.msra.mxu0 %v969_v13  ;;  %795 = vmatpush.bf16.msra.mxu2 %v973_v14 }
 0x144   : > { %v264_v20 = vsel %vm261_vm14, %v252_v45, %v263_v19  ;;  %v1018_v26 = vld [vmem:[#allocation2 + $0x24] sm:$0xf0]  ;;  %v954_v27 = vld [vmem:[#allocation2 + $0x28] sm:$0xf0] }
 0x145   : > { %268 = vst [vmem:[#allocation2 + $0x8] sm:$0xff] %v264_v20  ;;  %v953_v33 = vor.u32 %v1018_v26, %v952_v29  ;;  %v957_v25 = vor.u32 %v1017_v30, %v954_v27 }
 0x147   : > { %770 = vmatpush.bf16.msra.mxu0 %v961_v24  ;;  %796 = vmatpush.bf16.msra.mxu2 %v965_v2 }
 0x148   : > { %v625_v28 = vpop.permute.xlu1 %624 }
 0x149   : > { %v630_v32 = vrot.slane %v625_v28, 4 }
 0x14b   : > { %v635_v37 = vsel %vm259_vm0, %v630_v32, %v631_v31  ;;  %771 = vmatpush.bf16.msra.mxu0 %v953_v33  ;;  %797 = vmatpush.bf16.msra.mxu2 %v957_v25 }
 0x14c   : > { %v636_v40 = vsel %vm633_vm15, %v625_v28, %v635_v37  ;;  %v1014_v43 = vld [vmem:[#allocation2 + $0x4] sm:$0xf0]  ;;  %v938_v45 = vld [vmem:[#allocation2 + $0x8] sm:$0xf0] }
 0x14d   : > { %640 = vst [vmem:[#allocation2 + $0x88] sm:$0xff] %v636_v40  ;;  %v937_v48 = vor.u32 %v1014_v43, %v936_v46  ;;  %v941_v50 = vor.u32 %v1013_v47, %v938_v45 }
 0x14f   : > { %772 = vmatpush.bf16.msra.mxu0 %v945_v41  ;;  %798 = vmatpush.bf16.msra.mxu2 %v949_v42 }
 0x153   : > { %773 = vmatpush.bf16.msra.mxu0 %v937_v48  ;;  %799 = vmatpush.bf16.msra.mxu2 %v941_v50 }
 0x154   : > { %v1030_v53 = vld [vmem:[#allocation2 + $0x84] sm:$0xf0]  ;;  %v1002_v54 = vld [vmem:[#allocation2 + $0x88] sm:$0xf0] }
 0x155   : > { %v1001_v12 = vor.u32 %v1030_v53, %v1000_v16  ;;  %v1005_v55 = vor.u32 %v1029_v17, %v1002_v54 }
 0x156   : > { %800 = vmatmul.bf16.vlgmr.msra.gmra.mxu2 %v669_v52  ;;  %774 = vmatmul.bf16.vlgmr.msra.gmra.mxu0 %v669_v52 }
 0x157   : > { %786 = vmatpush.bf16.msra.mxu1 %v1001_v12  ;;  %812 = vmatpush.bf16.msra.mxu3 %v1005_v55 }
 0x15a   : > { %1006 = vmatmul.msk.bf16.vlgmr.msra.gmra.mxu1 %vm762_vm1, %v670_v56  ;;  %1007 = vmatmul.msk.bf16.vlgmr.msra.gmra.mxu3 %vm762_vm1, %v670_v56 }
 0x17f   : > { %v664_v58 = vpop.permute.xlu0 %663 }
 0x1d3   : > { %v775_v59 = vpop.f32.mrf.mxu0 }
 0x1d4   : > { %v776_v60 = vadd.f32 %v775_v59, %v664_v58 }
 0x1d7   : > { %v788_v61 = vpop.f32.mrf.mxu1 }
 0x1d8   : > { %v789_v49 = vadd.f32 %v788_v61, %v776_v60 }
 0x1d9   : > { %v801_v57 = vpop.f32.mrf.mxu2 }
 0x1da   : > { %v1008_v62 = vmul.f32 -1.442695, %v789_v49  ;;  %v802_v63 = vadd.f32 %v801_v57, %v664_v58 }
 0x1db   : > { %v777_v0 = vpop.f32.mrf.mxu0 }
 0x1dc   : > { %1087 = vpow2.f32 %v1008_v62 }
 0x1dd   : > { %v814_v1 = vpop.f32.mrf.mxu3 }
 0x1de   : > { %v815_v3 = vadd.f32 %v814_v1, %v802_v63 }
 0x1df   : > { %v790_v4 = vpop.f32.mrf.mxu1 }
 0x1e0   : > { %v1009_v5 = vmul.f32 -1.442695, %v815_v3 }
 0x1e1   : > { %v803_v6 = vpop.f32.mrf.mxu2 }
 0x1e2   : > { %v1088_v7 = vpop.eup %1087  ;;  %1089 = vpow2.f32 %v1009_v5 }
 0x1e3   : > { %v824_v8 = vadd.f32 1.0, %v1088_v7 }
 0x1e5   : > { %1091 = vrcp.f32 %v824_v8  ;;  %v816_v9 = vpop.f32.mrf.mxu3  ;;  %vm831_vm2 = vweird.f32 %v824_v8  ;;  %v837_v23 = vand.u32 2147483648, %v824_v8  ;;  %v835_v24 = vand.u32 2147483647, %v824_v8 }
 0x1e7   : > { %v838_v29 = vor.u32 1.1754944e-38, %v837_v23  ;;  %vm836_vm6 = vcmp.eq.f32.partialorder %v835_v24, 8.507059e+37 }
 0x1e8   : > { %v1090_v10 = vpop.eup %1089 }
 0x1e9   : > { %v825_v11 = vadd.f32 1.0, %v1090_v10 }
 0x1eb   : > { %v1092_v13 = vpop.eup %1091  ;;  %1093 = vrcp.f32 %v825_v11  ;;  %v852_v21 = vand.u32 2147483648, %v825_v11  ;;  %v850_v28 = vand.u32 2147483647, %v825_v11  ;;  %vm846_vm7 = vweird.f32 %v825_v11 }
 0x1ec   : > { %v827_v14 = vmul.f32 %v1092_v13, %v824_v8  ;;  %vm832_vm3 = vweird.f32 %v1092_v13 }
 0x1ed   : > { %vm833_vm4 = vmor %vm831_vm2, %vm832_vm3  ;;  %v853_v32 = vor.u32 1.1754944e-38, %v852_v21  ;;  %vm851_vm9 = vcmp.eq.f32.partialorder %v850_v28, 8.507059e+37 }
 0x1ee   : > { %v828_v15 = vsub.f32 1.0, %v827_v14 }
 0x1f0   : > { %v829_v18 = vmul.f32 %v1092_v13, %v828_v15 }
 0x1f1   : > { %v1094_v19 = vpop.eup %1093 }
 0x1f2   : > { %v830_v20 = vadd.f32 %v1092_v13, %v829_v18  ;;  %v842_v22 = vmul.f32 %v1094_v19, %v825_v11  ;;  %vm847_vm5 = vweird.f32 %v1094_v19 }
 0x1f3   : > { %vm848_vm8 = vmor %vm846_vm7, %vm847_vm5 }
 0x1f4   : > { %v843_v2 = vsub.f32 1.0, %v842_v22  ;;  %v834_v26 = vsel %vm833_vm4, %v1092_v13, %v830_v20 }
 0x1f5   : > { %v839_v31 = vsel %vm836_vm6, %v838_v29, %v834_v26 }
 0x1f6   : > { %v844_v27 = vmul.f32 %v1094_v19, %v843_v2  ;;  %v858_v34 = vrot.slane %v839_v31, 4 }
 0x1f8   : > { %v845_v30 = vadd.f32 %v1094_v19, %v844_v27  ;;  %v862_v38 = vmul.f32 %v858_v34, %v789_v49 }
 0x1fa   : > { %v849_v33 = vsel %vm848_vm8, %v1094_v19, %v845_v30 }
 0x1fb   : > { %v854_v25 = vsel %vm851_vm9, %v853_v32, %v849_v33 }
 0x1fc   : > { %v859_v35 = vrot.slane %v854_v25, 4 }
 0x1fe   : > { %v863_v36 = vmul.f32 %v859_v35, %v815_v3 }
 0x200   : > { %v866_v37 = vrot.slane %v863_v36, 4 }
 0x202   : > { %v868_v39 = vsel %vm259_vm0, %v862_v38, %v866_v37 }
 0x203   : > { %870 = vst [vmem:[%s197_s21] sm:$0xff] %v868_v39 }
 0x204 PF: > { %s14_s15 = sadd.s32 1, %s1101_s15  }
 0x205   : > { %p11_p4 = scmp.ge.s32.totalorder %s14_s15, 4  }
 0x207   :  { %13 = sbr.rel (!%p11_p4) target bundleno = 1 (0x1), region = 66 }

</bundles_post_ra>
